<compile_context>
chip_gen: v6e
topology: v6e:2x2x1
jax: 0.10.0
libtpu: 0.0.40
codegen_flags: <defaults>
</compile_context>

<pallas_src>
import math
import jax
import jax.numpy as jnp
from jax.experimental import pallas as pl
from jax.experimental.pallas import tpu as pltpu

_LANE = 128       # lane width (last-dim vreg size)
_SUBLANE = 8      # f32 sublane count (second-to-last dim granularity)


def _round_up(x, m):
    return ((x + m - 1) // m) * m


def _pad2d(arr, shape):
    """Zero-pad a 2-D array up to `shape` (no-op if already that shape)."""
    if tuple(arr.shape) == tuple(shape):
        return arr
    return jnp.zeros(shape, arr.dtype).at[:arr.shape[0], :arr.shape[1]].set(arr)


def dqn_kernel(x_ref,
               w1_ref, b1_ref,
               w2_ref, b2_ref,
               w3_ref, b3_ref,
               w4_ref, b4_ref,
               o_ref):
    # One batch tile; all four GEMMs + ReLUs fused.  Weights may be bf16 (MXU
    # inputs); accumulation, bias-add and ReLU stay f32 (v5e has no bf16 VPU).
    wdt = w1_ref.dtype
    x = x_ref[...].astype(wdt)
    h = jnp.maximum(
        jnp.dot(x, w1_ref[...], preferred_element_type=jnp.float32)
        + b1_ref[...], 0.0)
    h = jnp.maximum(
        jnp.dot(h.astype(wdt), w2_ref[...], preferred_element_type=jnp.float32)
        + b2_ref[...], 0.0)
    h = jnp.maximum(
        jnp.dot(h.astype(wdt), w3_ref[...], preferred_element_type=jnp.float32)
        + b3_ref[...], 0.0)
    # Final layer: store only the real action lanes (tiny writeback, no
    # wrapper-side slice needed).
    o_ref[...] = (jnp.dot(h.astype(wdt), w4_ref[...],
                          preferred_element_type=jnp.float32)
                  + b4_ref[...]).astype(o_ref.dtype)


def dqn_forward(state, params, *, block_b=1024, param_dtype=None,
                use_core_parallel=False):
    """state: [B, state_size] f32; params: ((w, b), ...) per layer with
    w: [in, out], b: [1, out].  Returns [B, action_size] f32 Q-values.

    param_dtype:       optionally cast weights (not biases) to e.g. bf16.
    use_core_parallel: shard the batch grid axis across TensorCores (v7x).
    """
    (w1, b1), (w2, b2), (w3, b3), (w4, b4) = params
    B, S = state.shape
    h1, h2, h3 = w1.shape[1], w2.shape[1], w3.shape[1]
    A = w4.shape[1]

    # --- lane-dense hidden widths (exact: zero weights/bias, ReLU(0)=0) ------
    h1p, h2p, h3p = (_round_up(h, _LANE) for h in (h1, h2, h3))
    w1 = _pad2d(w1, (S, h1p));    b1 = _pad2d(b1, (1, h1p))
    w2 = _pad2d(w2, (h1p, h2p));  b2 = _pad2d(b2, (1, h2p))
    w3 = _pad2d(w3, (h2p, h3p));  b3 = _pad2d(b3, (1, h3p))
    w4 = _pad2d(w4, (h3p, A))     # out-dim stays A: kernel stores only real lanes

    if param_dtype is not None:
        w1, w2, w3, w4 = (w.astype(param_dtype) for w in (w1, w2, w3, w4))
        # biases stay f32 so bias-add / ReLU remain f32 on the VPU

    # --- batch tiling: multiple of 8 sublanes; ragged last tile is clipped ---
    tb = _round_up(max(1, min(block_b, B)), _SUBLANE)
    grid = (pl.cdiv(B, tb),)

    # --- cost estimate so XLA schedules surrounding ops sanely ----------------
    flops = 2 * B * (S * h1p + h1p * h2p + h2p * h3p + h3p * A)
    weight_bytes = sum(int(a.size) * a.dtype.itemsize
                       for a in (w1, b1, w2, b2, w3, b3, w4, b4))
    bytes_accessed = (int(state.size) * state.dtype.itemsize
                      + 4 * B * A + weight_bytes)

    def resident(arr):
        # Full-array block, same block index every grid step -> VMEM-resident.
        # Single-buffered: it is never re-fetched, so a 2nd buffer is dead VMEM.
        return pl.BlockSpec(arr.shape, lambda i: (0, 0),
                            pipeline_mode=pl.Buffered(1))

    batch_sem = pltpu.CORE_PARALLEL if use_core_parallel else "parallel"

    return pl.pallas_call(
        dqn_kernel,
        out_shape=jax.ShapeDtypeStruct((B, A), jnp.float32),
        grid=grid,
        in_specs=[pl.BlockSpec((tb, S), lambda i: (i, 0)),
                  resident(w1), resident(b1),
                  resident(w2), resident(b2),
                  resident(w3), resident(b3),
                  resident(w4), resident(b4)],
        out_specs=pl.BlockSpec((tb, A), lambda i: (i, 0)),
        compiler_params=pltpu.CompilerParams(
            dimension_semantics=(batch_sem,)),
        cost_estimate=pl.CostEstimate(
            flops=flops, transcendentals=0, bytes_accessed=bytes_accessed),
    )(state, w1, b1, w2, b2, w3, b3, w4, b4)


def init_dqn_params(key, state_size, action_size, hidden_size=64):
    """Deterministic init matching the PyTorch module:
       weights: xavier_uniform_, biases: PyTorch Linear default
       U(-1/sqrt(fan_in), 1/sqrt(fan_in))."""
    dims = [(state_size, hidden_size),
            (hidden_size, hidden_size),
            (hidden_size, hidden_size // 2),
            (hidden_size // 2, action_size)]
    params = []
    for (fan_in, fan_out) in dims:
        key, kw, kb = jax.random.split(key, 3)
        limit = math.sqrt(6.0 / (fan_in + fan_out))       # xavier uniform
        w = jax.random.uniform(kw, (fan_in, fan_out), jnp.float32, -limit, limit)
        b_bound = 1.0 / math.sqrt(fan_in)                 # PyTorch default bias init
        b = jax.random.uniform(kb, (1, fan_out), jnp.float32, -b_bound, b_bound)
        params.append((w, b))
    return tuple(params)


def dqn_reference(state, params):
    (w1, b1), (w2, b2), (w3, b3), (w4, b4) = params
    h = jnp.maximum(state @ w1 + b1, 0.0)
    h = jnp.maximum(h @ w2 + b2, 0.0)
    h = jnp.maximum(h @ w3 + b3, 0.0)
    return h @ w4 + b4


if __name__ == "__main__":
    key = jax.random.PRNGKey(0)

    # --- small shapes consistent with the module (maze DQN) ------------------
    batch = 2
    state_size = 8       # flattened maze-state features
    action_size = 4      # up/down/left/right
    hidden_size = 32

    key, k_state, k_params = jax.random.split(key, 3)
    state = jax.random.normal(k_state, (batch, state_size), jnp.float32)
    params = init_dqn_params(k_params, state_size, action_size, hidden_size)

    out = jax.block_until_ready(dqn_forward(state, params))
    ref = dqn_reference(state, params)
    assert out.shape == (batch, action_size)
    assert jnp.allclose(out, ref, atol=1e-4, rtol=1e-4)

    # --- exercise the multi-step grid + ragged (clipped) last tile -----------
    key, k_state2, k_params2 = jax.random.split(key, 3)
    big_batch = 300      # not a multiple of the tile -> clipped edge tile
    state2 = jax.random.normal(k_state2, (big_batch, state_size), jnp.float32)
    params2 = init_dqn_params(k_params2, state_size, action_size, hidden_size=64)
    out2 = jax.block_until_ready(dqn_forward(state2, params2, block_b=128))
    ref2 = dqn_reference(state2, params2)
    assert out2.shape == (big_batch, action_size)
    assert jnp.allclose(out2, ref2, atol=1e-4, rtol=1e-4)

    # --- optional bf16-weight path (v6e/v7x sizing; f32 accumulation) --------
    out3 = jax.block_until_ready(
        dqn_forward(state2, params2, block_b=256, param_dtype=jnp.bfloat16))
    assert out3.shape == (big_batch, action_size)
    assert jnp.allclose(out3, ref2, atol=1e-1, rtol=1e-1)

    # TODO(synk): on v7x pass use_core_parallel=True to shard the batch grid
    # axis across both TensorCores (no-op / left off for single-TC v5e/v6e).
    print("KERNEL_OK")
</pallas_src>

<mosaic_0001>
module attributes {stable_mosaic.version = 11 : i64} {
  func.func @dqn_kernel(%arg0: i32, %arg1: memref<8x8xf32, #tpu.memory_space<vmem>>, %arg2: memref<8x128xf32, #tpu.memory_space<vmem>>, %arg3: memref<1x128xf32, #tpu.memory_space<vmem>>, %arg4: memref<128x128xf32, #tpu.memory_space<vmem>>, %arg5: memref<1x128xf32, #tpu.memory_space<vmem>>, %arg6: memref<128x128xf32, #tpu.memory_space<vmem>>, %arg7: memref<1x128xf32, #tpu.memory_space<vmem>>, %arg8: memref<128x4xf32, #tpu.memory_space<vmem>>, %arg9: memref<1x4xf32, #tpu.memory_space<vmem>>, %arg10: memref<8x4xf32, #tpu.memory_space<vmem>>) attributes {dimension_semantics = [#tpu.dimension_semantics<parallel>], iteration_bounds = array<i64: 1>, scalar_prefetch = 0 : i64, scratch_operands = 0 : i64, tpu.core_type = #tpu.core_type<tc>, window_params = [{transform_indices = @transform_0, window_bounds = array<i64: 8, 8>}, {pipeline_mode = #tpu.pipeline_mode<synchronous>, transform_indices = @transform_1, window_bounds = array<i64: 8, 128>}, {pipeline_mode = #tpu.pipeline_mode<synchronous>, transform_indices = @transform_2, window_bounds = array<i64: 1, 128>}, {pipeline_mode = #tpu.pipeline_mode<synchronous>, transform_indices = @transform_3, window_bounds = array<i64: 128, 128>}, {pipeline_mode = #tpu.pipeline_mode<synchronous>, transform_indices = @transform_4, window_bounds = array<i64: 1, 128>}, {pipeline_mode = #tpu.pipeline_mode<synchronous>, transform_indices = @transform_5, window_bounds = array<i64: 128, 128>}, {pipeline_mode = #tpu.pipeline_mode<synchronous>, transform_indices = @transform_6, window_bounds = array<i64: 1, 128>}, {pipeline_mode = #tpu.pipeline_mode<synchronous>, transform_indices = @transform_7, window_bounds = array<i64: 128, 4>}, {pipeline_mode = #tpu.pipeline_mode<synchronous>, transform_indices = @transform_8, window_bounds = array<i64: 1, 4>}, {transform_indices = @transform_9, window_bounds = array<i64: 8, 4>}]} {
    %c0 = arith.constant 0 : index
    %c0_0 = arith.constant 0 : index
    %0 = vector.load %arg1[%c0, %c0_0] : memref<8x8xf32, #tpu.memory_space<vmem>>, vector<8x8xf32>
    %c0_1 = arith.constant 0 : index
    %c0_2 = arith.constant 0 : index
    %1 = vector.load %arg2[%c0_1, %c0_2] : memref<8x128xf32, #tpu.memory_space<vmem>>, vector<8x128xf32>
    %cst = arith.constant dense<0.000000e+00> : vector<8x128xf32>
    %2 = tpu.matmul %0, %1, %cst {dimension_numbers = #tpu.dot_dimension_numbers<[1], [0], [0], [1], [0, 0, 1, 1], [], []>} : vector<8x8xf32>, vector<8x128xf32>, vector<8x128xf32> -> vector<8x128xf32>
    %c0_3 = arith.constant 0 : index
    %c0_4 = arith.constant 0 : index
    %3 = vector.load %arg3[%c0_3, %c0_4] : memref<1x128xf32, #tpu.memory_space<vmem>>, vector<1x128xf32>
    %4 = vector.broadcast %3 : vector<1x128xf32> to vector<8x128xf32>
    %5 = arith.addf %2, %4 : vector<8x128xf32>
    %cst_5 = arith.constant 0.000000e+00 : f32
    %6 = vector.broadcast %cst_5 : f32 to vector<8x128xf32>
    %7 = arith.maximumf %5, %6 : vector<8x128xf32>
    %c0_6 = arith.constant 0 : index
    %c0_7 = arith.constant 0 : index
    %8 = vector.load %arg4[%c0_6, %c0_7] : memref<128x128xf32, #tpu.memory_space<vmem>>, vector<128x128xf32>
    %cst_8 = arith.constant dense<0.000000e+00> : vector<8x128xf32>
    %9 = tpu.matmul %7, %8, %cst_8 {dimension_numbers = #tpu.dot_dimension_numbers<[1], [0], [0], [1], [0, 0, 1, 1], [], []>} : vector<8x128xf32>, vector<128x128xf32>, vector<8x128xf32> -> vector<8x128xf32>
    %c0_9 = arith.constant 0 : index
    %c0_10 = arith.constant 0 : index
    %10 = vector.load %arg5[%c0_9, %c0_10] : memref<1x128xf32, #tpu.memory_space<vmem>>, vector<1x128xf32>
    %11 = vector.broadcast %10 : vector<1x128xf32> to vector<8x128xf32>
    %12 = arith.addf %9, %11 : vector<8x128xf32>
    %cst_11 = arith.constant 0.000000e+00 : f32
    %13 = vector.broadcast %cst_11 : f32 to vector<8x128xf32>
    %14 = arith.maximumf %12, %13 : vector<8x128xf32>
    %c0_12 = arith.constant 0 : index
    %c0_13 = arith.constant 0 : index
    %15 = vector.load %arg6[%c0_12, %c0_13] : memref<128x128xf32, #tpu.memory_space<vmem>>, vector<128x128xf32>
    %cst_14 = arith.constant dense<0.000000e+00> : vector<8x128xf32>
    %16 = tpu.matmul %14, %15, %cst_14 {dimension_numbers = #tpu.dot_dimension_numbers<[1], [0], [0], [1], [0, 0, 1, 1], [], []>} : vector<8x128xf32>, vector<128x128xf32>, vector<8x128xf32> -> vector<8x128xf32>
    %c0_15 = arith.constant 0 : index
    %c0_16 = arith.constant 0 : index
    %17 = vector.load %arg7[%c0_15, %c0_16] : memref<1x128xf32, #tpu.memory_space<vmem>>, vector<1x128xf32>
    %18 = vector.broadcast %17 : vector<1x128xf32> to vector<8x128xf32>
    %19 = arith.addf %16, %18 : vector<8x128xf32>
    %cst_17 = arith.constant 0.000000e+00 : f32
    %20 = vector.broadcast %cst_17 : f32 to vector<8x128xf32>
    %21 = arith.maximumf %19, %20 : vector<8x128xf32>
    %c0_18 = arith.constant 0 : index
    %c0_19 = arith.constant 0 : index
    %22 = vector.load %arg8[%c0_18, %c0_19] : memref<128x4xf32, #tpu.memory_space<vmem>>, vector<128x4xf32>
    %cst_20 = arith.constant dense<0.000000e+00> : vector<8x4xf32>
    %23 = tpu.matmul %21, %22, %cst_20 {dimension_numbers = #tpu.dot_dimension_numbers<[1], [0], [0], [1], [0, 0, 1, 1], [], []>} : vector<8x128xf32>, vector<128x4xf32>, vector<8x4xf32> -> vector<8x4xf32>
    %c0_21 = arith.constant 0 : index
    %c0_22 = arith.constant 0 : index
    %24 = vector.load %arg9[%c0_21, %c0_22] : memref<1x4xf32, #tpu.memory_space<vmem>>, vector<1x4xf32>
    %25 = vector.broadcast %24 : vector<1x4xf32> to vector<8x4xf32>
    %26 = arith.addf %23, %25 : vector<8x4xf32>
    %c0_23 = arith.constant 0 : index
    %c0_24 = arith.constant 0 : index
    %27 = vector.load %arg10[%c0_23, %c0_24] : memref<8x4xf32, #tpu.memory_space<vmem>>, vector<8x4xf32>
    tpu.vector_store %arg10[%c0_23, %c0_24], %26 {strides = array<i32>} : memref<8x4xf32, #tpu.memory_space<vmem>>, vector<8x4xf32>,
    return
  }
  func.func @transform_0(%arg0: i32) -> (i32, i32) {
    %c0_i32 = arith.constant 0 : i32
    %c0_i32_0 = arith.constant 0 : i32
    return %arg0, %c0_i32 : i32, i32
  }
  func.func @transform_1(%arg0: i32) -> (i32, i32) {
    %c0_i32 = arith.constant 0 : i32
    %c0_i32_0 = arith.constant 0 : i32
    %c0_i32_1 = arith.constant 0 : i32
    return %c0_i32, %c0_i32_0 : i32, i32
  }
  func.func @transform_2(%arg0: i32) -> (i32, i32) {
    %c0_i32 = arith.constant 0 : i32
    %c0_i32_0 = arith.constant 0 : i32
    %c0_i32_1 = arith.constant 0 : i32
    return %c0_i32, %c0_i32_0 : i32, i32
  }
  func.func @transform_3(%arg0: i32) -> (i32, i32) {
    %c0_i32 = arith.constant 0 : i32
    %c0_i32_0 = arith.constant 0 : i32
    %c0_i32_1 = arith.constant 0 : i32
    return %c0_i32, %c0_i32_0 : i32, i32
  }
  func.func @transform_4(%arg0: i32) -> (i32, i32) {
    %c0_i32 = arith.constant 0 : i32
    %c0_i32_0 = arith.constant 0 : i32
    %c0_i32_1 = arith.constant 0 : i32
    return %c0_i32, %c0_i32_0 : i32, i32
  }
  func.func @transform_5(%arg0: i32) -> (i32, i32) {
    %c0_i32 = arith.constant 0 : i32
    %c0_i32_0 = arith.constant 0 : i32
    %c0_i32_1 = arith.constant 0 : i32
    return %c0_i32, %c0_i32_0 : i32, i32
  }
  func.func @transform_6(%arg0: i32) -> (i32, i32) {
    %c0_i32 = arith.constant 0 : i32
    %c0_i32_0 = arith.constant 0 : i32
    %c0_i32_1 = arith.constant 0 : i32
    return %c0_i32, %c0_i32_0 : i32, i32
  }
  func.func @transform_7(%arg0: i32) -> (i32, i32) {
    %c0_i32 = arith.constant 0 : i32
    %c0_i32_0 = arith.constant 0 : i32
    %c0_i32_1 = arith.constant 0 : i32
    return %c0_i32, %c0_i32_0 : i32, i32
  }
  func.func @transform_8(%arg0: i32) -> (i32, i32) {
    %c0_i32 = arith.constant 0 : i32
    %c0_i32_0 = arith.constant 0 : i32
    %c0_i32_1 = arith.constant 0 : i32
    return %c0_i32, %c0_i32_0 : i32, i32
  }
  func.func @transform_9(%arg0: i32) -> (i32, i32) {
    %c0_i32 = arith.constant 0 : i32
    %c0_i32_0 = arith.constant 0 : i32
    return %arg0, %c0_i32 : i32, i32
  }
}

</mosaic_0001>

<bundles_post_ra>
// kernel: tpu_custom_call.1
= control target key start
LH: loop header
LB: loop body
LE: loop exit
PB: predicated region body
PF: predicated region fallthrough
CT: control target
= control target key end

     0   :  { %14 = vsyncpa [#allocation3], 0  ;;  %s964_s0 = inlined_call_operand.hbm [shape: f32[2,8], index: 0, kind: input, shape index: {}]   ;;  %s965_s1 = inlined_call_operand.vmem [shape: f32[8,128], index: 1, kind: input, shape index: {}]   ;;  %s966_s2 = inlined_call_operand.vmem [shape: f32[1,128], index: 2, kind: input, shape index: {}]   ;;  %s967_s3 = inlined_call_operand.vmem [shape: f32[128,128], index: 3, kind: input, shape index: {}]   ;;  %s968_s4 = inlined_call_operand.hbm [shape: f32[1,128], index: 4, kind: input, shape index: {}]   ;;  %s969_s5 = inlined_call_operand.hbm [shape: f32[128,128], index: 5, kind: input, shape index: {}]   ;;  %s970_s6 = inlined_call_operand.vmem [shape: f32[1,128], index: 6, kind: input, shape index: {}]   ;;  %s971_s7 = inlined_call_operand.vmem [shape: f32[128,4], index: 7, kind: input, shape index: {}]   ;;  %s972_s8 = inlined_call_operand.vmem [shape: f32[1,4], index: 8, kind: input, shape index: {}]   ;;  %s973_s9 = inlined_call_operand.hbm [shape: f32[2,4], index: 9, kind: output, shape index: {}]  }
   0x1   :  { %15 = vsyncpa [#allocation6], 0 }
   0x2   :  { %16 = vsyncpa [#allocation4], 0 }
   0x3   :  { %21 = vsyncadd [#allocation3], 96  ;;  %s721_s30 = smov [#allocation5]   ;;  %s722_s11 = smov [#allocation2]  }
   0x4   :  { %s41_s10 = sshll.u32 %s721_s30, 4  ;;  %s22_s12 = sshll.u32 %s722_s11, 4  ;;  %s42_s10 = int_to_ptr.vmem [resolvable:$true] %s41_s10  ;;  %s23_s12 = int_to_ptr.vmem [resolvable:$true] %s22_s12 }
   0x5   :  { %s643_s13 = scalar_lea.vmem %s42_s10, 16  ;;  %s647_s14 = scalar_lea.vmem %s42_s10, 32 }
   0x6   :  { %p644_p0 = scmp.ne.s32.totalorder %s42_s10, %s643_s13  ;;  %p648_p1 = scmp.lt.s32.totalorder %s42_s10, %s42_s10 }
   0x7   :  { %p649_p2 = scmp.lt.s32.totalorder %s647_s14, %s643_s13 }
   0x9   :  { %p650_p3 = por %p649_p2, %p648_p1 }
   0xb   :  { %p651_p4 = pnand %p650_p3, %p644_p0 }
   0xd   :  { %654 = shalt.err (!%p651_p4)
}
   0xe   :  { %44 = dma.hbm_to_vmem [thread:$0]  %s968_s4, 16, %s42_s10, [#allocation6]  }
   0xf   :  { %s663_s17 = scalar_lea.vmem %s23_s12, 32  ;;  %s667_s18 = scalar_lea.vmem %s23_s12, 128 }
  0x10   :  { %p664_p5 = scmp.ne.s32.totalorder %s23_s12, %s663_s17  ;;  %p668_p6 = scmp.lt.s32.totalorder %s23_s12, %s23_s12 }
  0x11   :  { %p669_p7 = scmp.lt.s32.totalorder %s667_s18, %s663_s17 }
  0x13   :  { %p670_p8 = por %p669_p7, %p668_p6 }
  0x15   :  { %p671_p9 = pnand %p670_p8, %p664_p5 }
  0x17   :  { %674 = shalt.err (!%p671_p9)
}
  0x18   :  { %s723_s19 = smov 32   ;;  %s724_s20 = smov 2  }
  0x19   :  { %28 = dma.hbm_to_vmem [thread:$0]  %s964_s0, 32, %s23_s12, [#allocation3], %s723_s19, %s723_s19, %s724_s20  }
  0x1a   :  { %s725_s23 = smov [#allocation7]  }
  0x1b   :  { %s50_s24 = sshll.u32 %s725_s23, 4  ;;  %s51_s24 = int_to_ptr.vmem [resolvable:$true] %s50_s24 }
  0x1c   :  { %s683_s4 = scalar_lea.vmem %s51_s24, 2048  ;;  %p688_p11 = scmp.lt.s32.totalorder %s51_s24, %s51_s24 }
  0x1d   :  { %p684_p10 = scmp.ne.s32.totalorder %s51_s24, %s683_s4  ;;  %p689_p12 = scmp.lt.s32.totalorder %s683_s4, %s683_s4 }
  0x1f   :  { %p690_p13 = por %p689_p12, %p688_p11 }
  0x21   :  { %p691_p0 = pnand %p690_p13, %p684_p10 }
  0x23   :  { %694 = shalt.err (!%p691_p0)
}
  0x24   :  { %s726_s25 = smov 128   ;;  %s727_s26 = smov 8  }
  0x25   :  { %56 = dma.hbm_to_vmem [thread:$0]  %s969_s5, 2048, %s51_s24, [#allocation6], %s726_s25, %s726_s25, %s727_s26  }
  0x26   :  { %715 = dma.done.wait [#allocation3], 128  }
  0x27   :  { %716 = vsyncadd [#allocation3], 4294967168 }
  0x28   :  { %717 = dma.done.wait [#allocation6], 2064  }
  0x29   :  { %718 = vsyncadd [#allocation6], 4294965232  ;;  %v728_v0 = vmov 0.0   ;;  %vm729_vm0 = vmmov 0   ;;  %vm81_vm1 = vcmask 64512   ;;  %v73_v1 = vld [vmem:[%s965_s1] sm:$0xff] }
  0x2a   :  { %515 = vmatprep.subr.mxu0 %v728_v0  ;;  %517 = vmatprep.mubr.msk.f32.mxu0 %vm729_vm0, %v728_v0  ;;  %v72_v2 = vld [vmem:[#allocation2] sm:$0xff]  ;;  %v171_v3 = vld [vmem:[%s967_s3 + $0x78] sm:$0xff]  ;;  %v170_v4 = vld [vmem:[%s967_s3 + $0x70] sm:$0xff]  ;;  %vm437_vm2 = vcmask 31744  }
  0x2b   :  { %520 = vmatprep.subr.mxu1 %v728_v0  ;;  %552 = vmatprep.mubr.msk.f32.mxu1 %vm729_vm0, %v728_v0  ;;  %v169_v5 = vld [vmem:[%s967_s3 + $0x68] sm:$0xff]  ;;  %v168_v6 = vld [vmem:[%s967_s3 + $0x60] sm:$0xff]  ;;  %v167_v7 = vld [vmem:[%s967_s3 + $0x58] sm:$0xff] }
  0x2c   :  { %516 = vmatpush3.msra.mxu0 %v73_v1  ;;  %521 = vmatpush3.msra.mxu1 %v171_v3  ;;  %v166_v8 = vld [vmem:[%s967_s3 + $0x50] sm:$0xff]  ;;  %v165_v9 = vld [vmem:[%s967_s3 + $0x48] sm:$0xff]  ;;  %v164_v10 = vld [vmem:[%s967_s3 + $0x40] sm:$0xff] }
  0x2d   :  { %518 = vmatmul.mubr.msk.f32.vlgmr.msra.gmra.mxu0 %vm81_vm1, %v72_v2  ;;  %522 = vmatprep.subr.mxu1 %v728_v0  ;;  %v163_v11 = vld [vmem:[%s967_s3 + $0x38] sm:$0xff]  ;;  %v162_v12 = vld [vmem:[%s967_s3 + $0x30] sm:$0xff]  ;;  %v161_v13 = vld [vmem:[%s967_s3 + $0x28] sm:$0xff] }
  0x2e   :  { %523 = vmatpush3.msra.mxu1 %v170_v4  ;;  %555 = vmatprep.subr.mxu0 %v728_v0  ;;  %v160_v14 = vld [vmem:[%s967_s3 + $0x20] sm:$0xff]  ;;  %v159_v15 = vld [vmem:[%s967_s3 + $0x18] sm:$0xff]  ;;  %v158_v16 = vld [vmem:[%s967_s3 + $0x10] sm:$0xff] }
  0x2f   :  { %524 = vmatprep.subr.mxu1 %v728_v0  ;;  %587 = vmatprep.mubr.msk.f32.mxu0 %vm729_vm0, %v728_v0  ;;  %v157_v17 = vld [vmem:[%s967_s3 + $0x8] sm:$0xff]  ;;  %v156_v18 = vld [vmem:[%s967_s3] sm:$0xff]  ;;  %v263_v21 = vld [vmem:[#allocation7 + $0x68] sm:$0xff] }
  0x30   :  { %525 = vmatpush3.msra.mxu1 %v169_v5  ;;  %v265_v19 = vld [vmem:[#allocation7 + $0x78] sm:$0xff]  ;;  %v264_v20 = vld [vmem:[#allocation7 + $0x70] sm:$0xff]  ;;  %v262_v22 = vld [vmem:[#allocation7 + $0x60] sm:$0xff] }
  0x31   :  { %526 = vmatprep.subr.mxu1 %v728_v0  ;;  %556 = vmatpush3.msra.mxu0 %v265_v19  ;;  %v261_v23 = vld [vmem:[#allocation7 + $0x58] sm:$0xff]  ;;  %v260_v24 = vld [vmem:[#allocation7 + $0x50] sm:$0xff]  ;;  %v259_v25 = vld [vmem:[#allocation7 + $0x48] sm:$0xff] }
  0x32   :  { %527 = vmatpush3.msra.mxu1 %v168_v6  ;;  %557 = vmatprep.subr.mxu0 %v728_v0  ;;  %v258_v26 = vld [vmem:[#allocation7 + $0x40] sm:$0xff]  ;;  %v257_v27 = vld [vmem:[#allocation7 + $0x38] sm:$0xff]  ;;  %v256_v28 = vld [vmem:[#allocation7 + $0x30] sm:$0xff] }
  0x33   :  { %528 = vmatprep.subr.mxu1 %v728_v0  ;;  %558 = vmatpush3.msra.mxu0 %v264_v20  ;;  %v255_v29 = vld [vmem:[#allocation7 + $0x28] sm:$0xff]  ;;  %v254_v30 = vld [vmem:[#allocation7 + $0x20] sm:$0xff]  ;;  %v253_v31 = vld [vmem:[#allocation7 + $0x18] sm:$0xff] }
  0x34   :  { %529 = vmatpush3.msra.mxu1 %v167_v7  ;;  %559 = vmatprep.subr.mxu0 %v728_v0  ;;  %v457_v32 = vld [vmem:[%s966_s2] ss:$0 sm:$0xff]  ;;  %v251_v38 = vld [vmem:[#allocation7 + $0x8] sm:$0xff]  ;;  %v250_v39 = vld [vmem:[#allocation7] sm:$0xff] }
  0x35   :  { %530 = vmatprep.subr.mxu1 %v728_v0  ;;  %560 = vmatpush3.msra.mxu0 %v263_v21  ;;  %v252_v37 = vld [vmem:[#allocation7 + $0x10] sm:$0xff]  ;;  %v358_v41 = vld [vmem:[%s971_s7 + $0x70] sm:$0xff]  ;;  %v357_v42 = vld [vmem:[%s971_s7 + $0x68] sm:$0xff] }
  0x36   :  { %531 = vmatpush3.msra.mxu1 %v166_v8  ;;  %561 = vmatprep.subr.mxu0 %v728_v0  ;;  %v359_v40 = vld [vmem:[%s971_s7 + $0x78] sm:$0xff]  ;;  %v356_v43 = vld [vmem:[%s971_s7 + $0x60] sm:$0xff]  ;;  %v354_v45 = vld [vmem:[%s971_s7 + $0x50] sm:$0xff] }
  0x37   :  { %532 = vmatprep.subr.mxu1 %v728_v0  ;;  %562 = vmatpush3.msra.mxu0 %v262_v22  ;;  %v355_v44 = vld [vmem:[%s971_s7 + $0x58] sm:$0xff]  ;;  %v353_v46 = vld [vmem:[%s971_s7 + $0x48] sm:$0xff]  ;;  %v352_v47 = vld [vmem:[%s971_s7 + $0x40] sm:$0xff] }
  0x38   :  { %533 = vmatpush3.msra.mxu1 %v165_v9  ;;  %563 = vmatprep.subr.mxu0 %v728_v0  ;;  %v351_v48 = vld [vmem:[%s971_s7 + $0x38] sm:$0xff]  ;;  %v350_v49 = vld [vmem:[%s971_s7 + $0x30] sm:$0xff]  ;;  %v349_v50 = vld [vmem:[%s971_s7 + $0x28] sm:$0xff] }
  0x39   :  { %534 = vmatprep.subr.mxu1 %v728_v0  ;;  %564 = vmatpush3.msra.mxu0 %v261_v23  ;;  %v348_v51 = vld [vmem:[%s971_s7 + $0x20] sm:$0xff]  ;;  %v347_v52 = vld [vmem:[%s971_s7 + $0x18] sm:$0xff]  ;;  %v459_v53 = vld [vmem:[#allocation5] ss:$0 sm:$0xff] }
  0x3a   :  { %535 = vmatpush3.msra.mxu1 %v164_v10  ;;  %565 = vmatprep.subr.mxu0 %v728_v0  ;;  %v346_v58 = vld [vmem:[%s971_s7 + $0x10] sm:$0xff]  ;;  %v345_v59 = vld [vmem:[%s971_s7 + $0x8] sm:$0xff]  ;;  %v344_v60 = vld [vmem:[%s971_s7] sm:$0xff] }
  0x3b   :  { %536 = vmatprep.subr.mxu1 %v728_v0  ;;  %566 = vmatpush3.msra.mxu0 %v260_v24  ;;  %v460_v61 = vld [vmem:[%s970_s6] ss:$0 sm:$0xff] }
  0x3c   :  { %537 = vmatpush3.msra.mxu1 %v163_v11  ;;  %567 = vmatprep.subr.mxu0 %v728_v0  ;;  %v461_v3 = vld [vmem:[%s972_s8] ss:$0 sm:$0xff] }
  0x3d   :  { %538 = vmatprep.subr.mxu1 %v728_v0  ;;  %568 = vmatpush3.msra.mxu0 %v259_v25 }
  0x3e   :  { %539 = vmatpush3.msra.mxu1 %v162_v12  ;;  %569 = vmatprep.subr.mxu0 %v728_v0 }
  0x3f   :  { %540 = vmatprep.subr.mxu1 %v728_v0  ;;  %570 = vmatpush3.msra.mxu0 %v258_v26 }
  0x40   :  { %541 = vmatpush3.msra.mxu1 %v161_v13  ;;  %571 = vmatprep.subr.mxu0 %v728_v0 }
  0x41   :  { %542 = vmatprep.subr.mxu1 %v728_v0  ;;  %572 = vmatpush3.msra.mxu0 %v257_v27 }
  0x42   :  { %543 = vmatpush3.msra.mxu1 %v160_v14  ;;  %573 = vmatprep.subr.mxu0 %v728_v0 }
  0x43   :  { %544 = vmatprep.subr.mxu1 %v728_v0  ;;  %574 = vmatpush3.msra.mxu0 %v256_v28 }
  0x44   :  { %545 = vmatpush3.msra.mxu1 %v159_v15  ;;  %575 = vmatprep.subr.mxu0 %v728_v0 }
  0x45   :  { %546 = vmatprep.subr.mxu1 %v728_v0  ;;  %576 = vmatpush3.msra.mxu0 %v255_v29 }
  0x46   :  { %547 = vmatpush3.msra.mxu1 %v158_v16  ;;  %577 = vmatprep.subr.mxu0 %v728_v0 }
  0x47   :  { %548 = vmatprep.subr.mxu1 %v728_v0  ;;  %578 = vmatpush3.msra.mxu0 %v254_v30 }
  0x48   :  { %549 = vmatpush3.msra.mxu1 %v157_v17  ;;  %579 = vmatprep.subr.mxu0 %v728_v0 }
  0x49   :  { %550 = vmatprep.subr.mxu1 %v728_v0  ;;  %580 = vmatpush3.msra.mxu0 %v253_v31 }
  0x4a   :  { %551 = vmatpush3.msra.mxu1 %v156_v18  ;;  %581 = vmatprep.subr.mxu0 %v728_v0 }
  0x4b   :  { %590 = vmatprep.subr.mxu1 %v728_v0  ;;  %582 = vmatpush3.msra.mxu0 %v252_v37 }
  0x4c   :  { %583 = vmatprep.subr.mxu0 %v728_v0 }
  0x4d   :  { %584 = vmatpush3.msra.mxu0 %v251_v38 }
  0x4e   :  { %585 = vmatprep.subr.mxu0 %v728_v0 }
  0x4f   :  { %586 = vmatpush3.msra.mxu0 %v250_v39 }
  0xed   :  { %v151_v33 = vpop.f32.mrf.mxu0 }
  0xee   :  { %v152_v34 = vadd.f32 %v457_v32, %v151_v33 }
  0xef   :  { %v519_v35 = vpop.f32.mrf.mxu0 }
  0xf0   :  { %v155_v36 = vmax.f32 %v152_v34, 0.0 }
  0xf2   :  { %553 = vmatmul.mubr.f32.vlgmr.msra.gmra.mxu1 %v155_v36 }
  0xf3   :  { %622 = vmatprep.mubr.msk.f32.mxu1 %vm729_vm0, %v728_v0  ;;  %591 = vmatpush3.msra.mxu1 %v359_v40 }
  0xf4   :  { %592 = vmatprep.subr.mxu1 %v728_v0 }
  0xf5   :  { %593 = vmatpush3.msra.mxu1 %v358_v41 }
  0xf6   :  { %594 = vmatprep.subr.mxu1 %v728_v0 }
  0xf7   :  { %595 = vmatpush3.msra.mxu1 %v357_v42 }
  0xf8   :  { %596 = vmatprep.subr.mxu1 %v728_v0 }
  0xf9   :  { %597 = vmatpush3.msra.mxu1 %v356_v43 }
  0xfa   :  { %598 = vmatprep.subr.mxu1 %v728_v0 }
  0xfb   :  { %599 = vmatpush3.msra.mxu1 %v355_v44 }
  0xfc   :  { %600 = vmatprep.subr.mxu1 %v728_v0 }
  0xfd   :  { %601 = vmatpush3.msra.mxu1 %v354_v45 }
  0xfe   :  { %602 = vmatprep.subr.mxu1 %v728_v0 }
  0xff   :  { %603 = vmatpush3.msra.mxu1 %v353_v46 }
 0x100   :  { %604 = vmatprep.subr.mxu1 %v728_v0 }
 0x101   :  { %605 = vmatpush3.msra.mxu1 %v352_v47 }
 0x102   :  { %606 = vmatprep.subr.mxu1 %v728_v0 }
 0x103   :  { %607 = vmatpush3.msra.mxu1 %v351_v48 }
 0x104   :  { %608 = vmatprep.subr.mxu1 %v728_v0 }
 0x105   :  { %609 = vmatpush3.msra.mxu1 %v350_v49 }
 0x106   :  { %610 = vmatprep.subr.mxu1 %v728_v0 }
 0x107   :  { %611 = vmatpush3.msra.mxu1 %v349_v50 }
 0x108   :  { %612 = vmatprep.subr.mxu1 %v728_v0 }
 0x109   :  { %613 = vmatpush3.msra.mxu1 %v348_v51 }
 0x10a   :  { %614 = vmatprep.subr.mxu1 %v728_v0 }
 0x10b   :  { %615 = vmatpush3.msra.mxu1 %v347_v52 }
 0x10c   :  { %616 = vmatprep.subr.mxu1 %v728_v0 }
 0x10d   :  { %617 = vmatpush3.msra.mxu1 %v346_v58 }
 0x10e   :  { %618 = vmatprep.subr.mxu1 %v728_v0 }
 0x10f   :  { %619 = vmatpush3.msra.mxu1 %v345_v59 }
 0x110   :  { %620 = vmatprep.subr.mxu1 %v728_v0 }
 0x111   :  { %621 = vmatpush3.msra.mxu1 %v344_v60 }
 0x1b2   :  { %v245_v54 = vpop.f32.mrf.mxu1 }
 0x1b3   :  { %v246_v55 = vadd.f32 %v459_v53, %v245_v54 }
 0x1b4   :  { %v554_v56 = vpop.f32.mrf.mxu1 }
 0x1b5   :  { %v249_v57 = vmax.f32 %v246_v55, 0.0 }
 0x1b7   :  { %588 = vmatmul.mubr.f32.vlgmr.msra.gmra.mxu0 %v249_v57 }
 0x277   :  { %v339_v62 = vpop.f32.mrf.mxu0 }
 0x278   :  { %v340_v63 = vadd.f32 %v460_v61, %v339_v62 }
 0x279   :  { %v589_v1 = vpop.f32.mrf.mxu0 }
 0x27a   :  { %v343_v2 = vmax.f32 %v340_v63, 0.0 }
 0x27c   :  { %623 = vmatmul.mubr.f32.vlgmr.msra.gmra.mxu1 %v343_v2 }
 0x33c   :  { %v433_v4 = vpop.f32.mrf.mxu1 }
 0x33d   :  { %v434_v0 = vadd.f32 %v461_v3, %v433_v4 }
 0x33e   :  { %v624_v5 = vpop.f32.mrf.mxu1 }
 0x33f   :  { %438 = vst.msk [vmem:[#allocation8] sm:$0xff] %vm437_vm2, %v434_v0 }
 0x340   :  { %443 = vsyncadd [#allocation4], 96  ;;  %s730_s7 = smov [#allocation8]  }
 0x341   :  { %s444_s28 = sshll.u32 %s730_s7, 4  ;;  %s445_s28 = int_to_ptr.vmem [resolvable:$true] %s444_s28 }
 0x342   :  { %s695_s0 = scalar_lea.vmem %s445_s28, 32  ;;  %s699_s6 = scalar_lea.vmem %s445_s28, 128 }
 0x343   :  { %p696_p1 = scmp.ne.s32.totalorder %s445_s28, %s695_s0  ;;  %p700_p2 = scmp.lt.s32.totalorder %s445_s28, %s445_s28 }
 0x344   :  { %p701_p3 = scmp.lt.s32.totalorder %s699_s6, %s695_s0 }
 0x346   :  { %p702_p4 = por %p701_p3, %p700_p2 }
 0x348   :  { %p703_p5 = pnand %p702_p4, %p696_p1 }
 0x34a   :  { %706 = shalt.err (!%p703_p5)
}
 0x34b   :  { %450 = dma.vmem_to_hbm [thread:$0]  %s445_s28, 32, %s973_s9, [#allocation4], %s723_s19, %s723_s19, %s724_s20  }
 0x34c   :  { %719 = dma.done.wait [#allocation4], 128  }
 0x34d   :  { %720 = vsyncadd [#allocation4], 4294967168 }
 0x34e   :  { %454 = vsyncpa [#allocation3], 1 }
 0x34f   :  { %455 = vsyncpa [#allocation6], 1 }
 0x350   :  { %456 = vsyncpa [#allocation4], 1 }

</bundles_post_ra>
